<compile_context>
chip_gen: v6e
topology: v6e:2x2x1
jax: 0.10.0
libtpu: 0.0.40
codegen_flags: <defaults>
</compile_context>

<pallas_src>
import functools
import math

import jax
import jax.numpy as jnp
import numpy as np
from jax.experimental import pallas as pl
from jax.experimental.pallas import tpu as pltpu


def _round_up(x, m):
    return (x + m - 1) // m * m


# ----------------------------- Pallas kernel ------------------------------ #
def _matmul_bias_kernel(a_ref, w_ref, b_ref, o_ref):
    # a_ref: (TM, K)   packed im2col rows tile
    # w_ref: (K, G)    (block-diagonal) flattened conv weight, VMEM resident
    # b_ref: (1, G)    bias row, VMEM resident
    # o_ref: (TM, G)   output tile; G is a multiple of 128 (lane-dense store)
    acc = jnp.dot(a_ref[...], w_ref[...], preferred_element_type=jnp.float32)
    o_ref[...] = (acc + b_ref[...]).astype(o_ref.dtype)


def _conv_as_matmul(a_packed, w_kernel, b_row, *, tile_rows):
    """a_packed: (Mp, K); w_kernel: (K, G); b_row: (1, G) -> (Mp, G)."""
    Mp, K = a_packed.shape
    G = w_kernel.shape[1]
    itemsize = jnp.dtype(a_packed.dtype).itemsize

    return pl.pallas_call(
        _matmul_bias_kernel,
        out_shape=jax.ShapeDtypeStruct((Mp, G), a_packed.dtype),
        grid=(Mp // tile_rows,),
        in_specs=[
            pl.BlockSpec((tile_rows, K), lambda i: (i, 0)),   # packed-token tile
            pl.BlockSpec((K, G), lambda i: (0, 0)),           # weight (resident)
            pl.BlockSpec((1, G), lambda i: (0, 0)),           # bias   (resident)
        ],
        out_specs=pl.BlockSpec((tile_rows, G), lambda i: (i, 0)),
        compiler_params=pltpu.CompilerParams(
            dimension_semantics=("parallel",)),
        cost_estimate=pl.CostEstimate(
            flops=2 * Mp * K * G,
            transcendentals=0,
            bytes_accessed=(Mp * K + K * G + G + Mp * G) * itemsize),
    )(a_packed, w_kernel, b_row)


# ------------------------------ Tokenizer ---------------------------------- #
@functools.partial(jax.jit, static_argnames=("stride", "padding"))
def tokenizer_forward(x, weight, bias, *, stride, padding):
    """x: (N, C_in, H, W) NCHW, weight: (C_out, C_in, KH, KW), bias: (C_out,).

    Returns (N, H_out*W_out, C_out) matching
    Flatten(2,3)(Conv2d(...)(x)).transpose(-2,-1).
    """
    N, C_in, H, W = x.shape
    C_out, _, KH, KW = weight.shape
    s, pad = stride, padding
    H_out = (H + 2 * pad - KH) // s + 1
    W_out = (W + 2 * pad - KW) // s + 1
    P = H_out * W_out
    M = N * P
    Kdim = C_in * KH * KW

    # --- output lane packing: fold `pack` tokens per stored row so the output
    #     lane width G = pack * c_pad is a multiple of 128 --------------------
    LANE = 128
    if C_out % LANE == 0:
        pack, c_pad = 1, C_out
    else:
        pack = LANE // math.gcd(C_out, LANE)
        if pack <= 8:
            c_pad = C_out                      # e.g. C_out=64 -> pack=2, G=128
        else:                                  # awkward C_out: pad channels
            pack, c_pad = 1, _round_up(C_out, LANE)
    G = pack * c_pad

    Kp = _round_up(Kdim, 8)                    # lane-friendlier contraction dim

    # --- im2col in a single XLA pass; channel ordering (c, kh, kw) matches
    #     weight.reshape(C_out, C_in*KH*KW) -----------------------------------
    patches = jax.lax.conv_general_dilated_patches(
        x, filter_shape=(KH, KW), window_strides=(s, s),
        padding=[(pad, pad), (pad, pad)],
        dimension_numbers=("NCHW", "OIHW", "NCHW"))   # (N, Kdim, H_out, W_out)
    A = patches.reshape(N, Kdim, P).transpose(0, 2, 1).reshape(M, Kdim)

    # --- tile / padded sizes (keep >=2 grid steps when possible: v7x = 2 TCs) -
    rows_needed = -(-M // pack)                        # packed rows required
    tile_rows = max(8, min(512, _round_up(-(-rows_needed // 2), 8)))
    rows_pad = _round_up(rows_needed, tile_rows)
    M_pad = rows_pad * pack

    # One pad covering both token rows and K lanes (fuses with the transpose
    # above); the packing reshape below is a free row-major bitcast.
    A = jnp.pad(A, ((0, M_pad - M), (0, Kp - Kdim)))
    A_packed = A.reshape(rows_pad, pack * Kp)

    # --- weights: (Kdim, C_out) -> zero-pad, then block-diagonal over `pack` --
    w_flat = weight.reshape(C_out, Kdim).T.astype(x.dtype)          # (Kdim, C_out)
    w_kp = jnp.pad(w_flat, ((0, Kp - Kdim), (0, c_pad - C_out)))    # (Kp, c_pad)
    b_kp = jnp.pad(bias.astype(x.dtype), (0, c_pad - C_out))        # (c_pad,)
    if pack > 1:
        w_kernel = jnp.kron(jnp.eye(pack, dtype=x.dtype), w_kp)     # (pack*Kp, G)
        b_row = jnp.tile(b_kp, pack).reshape(1, G)
    else:
        w_kernel = w_kp
        b_row = b_kp.reshape(1, G)

    out_packed = _conv_as_matmul(A_packed, w_kernel, b_row, tile_rows=tile_rows)

    # Unfold packed rows (free reshape), drop row/channel padding.
    out = out_packed.reshape(M_pad, c_pad)[:M, :C_out]
    return out.reshape(N, P, C_out)


# ------------------------------- main -------------------------------------- #
if __name__ == "__main__":
    # Small shapes consistent with the module: batch=2, 3 input channels,
    # 16x16 spatial, kernel=3, stride=1, padding=1, 64 output channels.
    N, C_in, H, W = 2, 3, 16, 16
    C_out, K, stride, padding = 64, 3, 1, 1

    key = jax.random.PRNGKey(0)
    kx, kw, kb = jax.random.split(key, 3)

    x = jax.random.normal(kx, (N, C_in, H, W), dtype=jnp.float32)

    # Deterministic Kaiming-normal init for the conv weight (fan_in mode,
    # gain sqrt(2), as in nn.init.kaiming_normal_), plus a small bias.
    fan_in = C_in * K * K
    std = float(np.sqrt(2.0 / fan_in))
    weight = std * jax.random.normal(kw, (C_out, C_in, K, K), dtype=jnp.float32)
    bound = 1.0 / float(np.sqrt(fan_in))
    bias = jax.random.uniform(kb, (C_out,), dtype=jnp.float32,
                              minval=-bound, maxval=bound)

    out = tokenizer_forward(x, weight, bias, stride=stride, padding=padding)
    out = jax.block_until_ready(out)

    # Reference check (plain XLA conv), silent on success.
    ref = jax.lax.conv_general_dilated(
        x, weight, window_strides=(stride, stride),
        padding=[(padding, padding), (padding, padding)],
        dimension_numbers=("NCHW", "OIHW", "NCHW"))
    ref = ref + bias.reshape(1, C_out, 1, 1)
    ref = ref.reshape(N, C_out, -1).transpose(0, 2, 1)  # (N, P, C_out)
    np.testing.assert_allclose(np.asarray(out), np.asarray(ref),
                               rtol=1e-5, atol=1e-5)
    assert out.shape == (N, H * W, C_out)

    print("KERNEL_OK")
</pallas_src>

<mosaic_0001>
module attributes {stable_mosaic.version = 11 : i64} {
  func.func @_matmul_bias_kernel(%arg0: i32, %arg1: memref<128x64xf32, #tpu.memory_space<vmem>>, %arg2: memref<64x128xf32, #tpu.memory_space<vmem>>, %arg3: memref<1x128xf32, #tpu.memory_space<vmem>>, %arg4: memref<128x128xf32, #tpu.memory_space<vmem>>) attributes {dimension_semantics = [#tpu.dimension_semantics<parallel>], iteration_bounds = array<i64: 2>, scalar_prefetch = 0 : i64, scratch_operands = 0 : i64, tpu.core_type = #tpu.core_type<tc>, window_params = [{transform_indices = @transform_0, window_bounds = array<i64: 128, 64>}, {pipeline_mode = #tpu.pipeline_mode<synchronous>, transform_indices = @transform_1, window_bounds = array<i64: 64, 128>}, {pipeline_mode = #tpu.pipeline_mode<synchronous>, transform_indices = @transform_2, window_bounds = array<i64: 1, 128>}, {transform_indices = @transform_3, window_bounds = array<i64: 128, 128>}]} {
    %c0 = arith.constant 0 : index
    %c0_0 = arith.constant 0 : index
    %0 = vector.load %arg1[%c0, %c0_0] : memref<128x64xf32, #tpu.memory_space<vmem>>, vector<128x64xf32>
    %c0_1 = arith.constant 0 : index
    %c0_2 = arith.constant 0 : index
    %1 = vector.load %arg2[%c0_1, %c0_2] : memref<64x128xf32, #tpu.memory_space<vmem>>, vector<64x128xf32>
    %cst = arith.constant dense<0.000000e+00> : vector<128x128xf32>
    %2 = tpu.matmul %0, %1, %cst {dimension_numbers = #tpu.dot_dimension_numbers<[1], [0], [0], [1], [0, 0, 1, 1], [], []>} : vector<128x64xf32>, vector<64x128xf32>, vector<128x128xf32> -> vector<128x128xf32>
    %c0_3 = arith.constant 0 : index
    %c0_4 = arith.constant 0 : index
    %3 = vector.load %arg3[%c0_3, %c0_4] : memref<1x128xf32, #tpu.memory_space<vmem>>, vector<1x128xf32>
    %4 = vector.broadcast %3 : vector<1x128xf32> to vector<128x128xf32>
    %5 = arith.addf %2, %4 : vector<128x128xf32>
    %c0_5 = arith.constant 0 : index
    %c0_6 = arith.constant 0 : index
    %6 = vector.load %arg4[%c0_5, %c0_6] : memref<128x128xf32, #tpu.memory_space<vmem>>, vector<128x128xf32>
    tpu.vector_store %arg4[%c0_5, %c0_6], %5 {strides = array<i32>} : memref<128x128xf32, #tpu.memory_space<vmem>>, vector<128x128xf32>,
    return
  }
  func.func @transform_0(%arg0: i32) -> (i32, i32) {
    %c0_i32 = arith.constant 0 : i32
    %c0_i32_0 = arith.constant 0 : i32
    return %arg0, %c0_i32 : i32, i32
  }
  func.func @transform_1(%arg0: i32) -> (i32, i32) {
    %c0_i32 = arith.constant 0 : i32
    %c0_i32_0 = arith.constant 0 : i32
    %c0_i32_1 = arith.constant 0 : i32
    return %c0_i32, %c0_i32_0 : i32, i32
  }
  func.func @transform_2(%arg0: i32) -> (i32, i32) {
    %c0_i32 = arith.constant 0 : i32
    %c0_i32_0 = arith.constant 0 : i32
    %c0_i32_1 = arith.constant 0 : i32
    return %c0_i32, %c0_i32_0 : i32, i32
  }
  func.func @transform_3(%arg0: i32) -> (i32, i32) {
    %c0_i32 = arith.constant 0 : i32
    %c0_i32_0 = arith.constant 0 : i32
    return %arg0, %c0_i32 : i32, i32
  }
}

</mosaic_0001>

<bundles_post_ra>
// kernel: tile.8
= control target key start
LH: loop header
LB: loop body
LE: loop exit
PB: predicated region body
PF: predicated region fallthrough
CT: control target
= control target key end

     0   :  { %s22_s0 = inlined_call_operand.vmem [shape: f32[64], index: 0, kind: input, shape index: {}]   ;;  %s23_s1 = inlined_call_operand.vmem [shape: f32[2,64], index: 1, kind: output, shape index: {}]  }
   0x1   :  { %v4_v0 = vld [vmem:[%s22_s0] ss:$0 sm:$0xff] }
   0x2   :  { %5 = vst [vmem:[%s23_s1] sm:$0x3] %v4_v0 }

// kernel: tile.9
= control target key start
LH: loop header
LB: loop body
LE: loop exit
PB: predicated region body
PF: predicated region fallthrough
CT: control target
= control target key end

     0   :  { %vm8_vm0 = vcmask 523264   ;;  %vm14_vm1 = vcmask 1048064   ;;  %s42_s0 = inlined_call_operand.vmem [shape: f32[2,64], index: 0, kind: input, shape index: {}]   ;;  %s43_s1 = inlined_call_operand.vmem [shape: f32[1,128], index: 1, kind: output, shape index: {}]  }
   0x1   :  { %v5_v0 = vld [vmem:[%s42_s0] sm:$0x3]  ;;  %s25_s0 = smov 64  }
   0x2   :  { %6 = vst [vmem:[#allocation1] sm:$0x3] %v5_v0 }
   0x9   :  { %v11_v1 = vld [vmem:[#allocation1 + $0x1] sm:$0x1]   ;;  %v7_v2 = vld [vmem:[#allocation1] sm:$0x1]  }
   0xa   :  { %12 = vrot.lane.b32.xlu0 %v11_v1, %s25_s0  ;;  %9 = vst.msk [vmem:[#allocation0] sm:$0x1] %vm8_vm0, %v7_v2  }
  0x7c   :  { %v13_v3 = vpop.permute.xlu0 %12  }
  0x7d   :  { %15 = vst.msk [vmem:[#allocation0] sm:$0x1] %vm14_vm1, %v13_v3  }
  0x84   :  { %v20_v4 = vld [vmem:[#allocation0] sm:$0x1] }
  0x85   :  { %23 = vst [vmem:[%s43_s1] sm:$0x1] %v20_v4 }

// kernel: tokenizer_forward.1
= control target key start
LH: loop header
LB: loop body
LE: loop exit
PB: predicated region body
PF: predicated region fallthrough
CT: control target
= control target key end

     0   :  { %s615_s12 = smov 0   ;;  %s718_s0 = inlined_call_operand.vmem [shape: f32[256,64], index: 0, kind: input, shape index: {}]   ;;  %s719_s1 = inlined_call_operand.vmem [shape: f32[64,128], index: 1, kind: input, shape index: {}]   ;;  %s720_s2 = inlined_call_operand.vmem [shape: f32[1,128], index: 2, kind: input, shape index: {}]   ;;  %s721_s3 = inlined_call_operand.vmem [shape: f32[256,128], index: 3, kind: output, shape index: {}]  }
   0x1 LB: > { %s471_s13 = sadd.s32 4294967295, %s593_s12   ;;  %p475_p0 = scmp.ge.s32.totalorder %s593_s12, 1  ;;  %s593_s12 = sphi %s615_s12, %s13_s12  }
   0x2   : > { %p138_p1 = scmp.lt.s32.totalorder %s593_s12, 3 }
   0x4   : > { %p139_p2 = pnand %p475_p0, %p138_p1 }
   0x5   : > { %s476_s18 = sshll.u32 (!%p139_p2), %s471_s13, 4 }
   0x6   : > { %142 = sbr.rel (%p139_p2) target bundleno = 239 (0xef), region = 32  ;;  %p163_p3 = scmp.lt.s32.totalorder (!%p139_p2), %s476_s18, 31 }
   0xb   : > { %v197_v0 = vld [vmem:[%s719_s1 + $0x38] sm:$0xff]  ;;  %v196_v1 = vld [vmem:[%s719_s1 + $0x30] sm:$0xff]  ;;  %v195_v2 = vld [vmem:[%s719_s1 + $0x28] sm:$0xff]  ;;  %s723_s18 = smov (!%p163_p3, %s476_s18), 31  ;;  %vm205_vm0 = vcmask 523264  }
   0xc   : > { %523 = vmatprep.subr.mxu0 %v197_v0  ;;  %563 = vmatprep.subr.mxu1 %v197_v0  ;;  %v194_v3 = vld [vmem:[%s719_s1 + $0x20] sm:$0xff]  ;;  %v193_v4 = vld [vmem:[%s719_s1 + $0x18] sm:$0xff]  ;;  %v192_v5 = vld [vmem:[%s719_s1 + $0x10] sm:$0xff]  ;;  %s477_s27 = sshll.u32 %s723_s18, 3 }
   0xd   : > { %524 = vmatpush3.msra.mxu0 %v197_v0  ;;  %571 = vmatpush3.msra.mxu1 %v197_v0  ;;  %v191_v6 = vld [vmem:[%s719_s1 + $0x8] sm:$0xff]  ;;  %s652_s5 = scalar_lea.vmem %s718_s0, %s477_s27  ;;  %v190_v7 = vld [vmem:[%s719_s1] sm:$0xff]  ;;  %s697_s13 = scalar_lea.vmem %s721_s3, %s477_s27 }
   0xe   : > { %525 = vmatprep.subr.mxu0 %v196_v1  ;;  %564 = vmatprep.subr.mxu1 %v196_v1  ;;  %v174_v8 = vld [vmem:[%s652_s5] sm:$0xff]  ;;  %v175_v10 = vld [vmem:[%s652_s5 + $0x8] sm:$0xff]  ;;  %v176_v12 = vld [vmem:[%s652_s5 + $0x10] sm:$0xff] }
   0xf   : > { %526 = vmatpush3.msra.mxu0 %v196_v1  ;;  %572 = vmatpush3.msra.mxu1 %v196_v1  ;;  %v182_v9 = vld [vmem:[%s652_s5 + $0x40] sm:$0xff]  ;;  %v183_v11 = vld [vmem:[%s652_s5 + $0x48] sm:$0xff]  ;;  %v184_v13 = vld [vmem:[%s652_s5 + $0x50] sm:$0xff] }
  0x10   : > { %527 = vmatprep.subr.mxu0 %v195_v2  ;;  %565 = vmatprep.subr.mxu1 %v195_v2  ;;  %v177_v14 = vld [vmem:[%s652_s5 + $0x18] sm:$0xff]  ;;  %v178_v16 = vld [vmem:[%s652_s5 + $0x20] sm:$0xff]  ;;  %v179_v18 = vld [vmem:[%s652_s5 + $0x28] sm:$0xff] }
  0x11   : > { %528 = vmatpush3.msra.mxu0 %v195_v2  ;;  %573 = vmatpush3.msra.mxu1 %v195_v2  ;;  %v185_v15 = vld [vmem:[%s652_s5 + $0x58] sm:$0xff]  ;;  %v186_v17 = vld [vmem:[%s652_s5 + $0x60] sm:$0xff]  ;;  %v187_v19 = vld [vmem:[%s652_s5 + $0x68] sm:$0xff] }
  0x12   : > { %529 = vmatprep.subr.mxu0 %v194_v3  ;;  %566 = vmatprep.subr.mxu1 %v194_v3  ;;  %v180_v20 = vld [vmem:[%s652_s5 + $0x30] sm:$0xff]  ;;  %v181_v22 = vld [vmem:[%s652_s5 + $0x38] sm:$0xff]  ;;  %v480_v24 = vld [vmem:[%s720_s2] ss:$0 sm:$0xff] }
  0x13   : > { %530 = vmatpush3.msra.mxu0 %v194_v3  ;;  %574 = vmatpush3.msra.mxu1 %v194_v3  ;;  %v188_v21 = vld [vmem:[%s652_s5 + $0x70] sm:$0xff]  ;;  %v189_v23 = vld [vmem:[%s652_s5 + $0x78] sm:$0xff] }
  0x14   : > { %531 = vmatprep.subr.mxu0 %v193_v4  ;;  %567 = vmatprep.subr.mxu1 %v193_v4 }
  0x15   : > { %532 = vmatpush3.msra.mxu0 %v193_v4  ;;  %575 = vmatpush3.msra.mxu1 %v193_v4 }
  0x16   : > { %533 = vmatprep.subr.mxu0 %v192_v5  ;;  %568 = vmatprep.subr.mxu1 %v192_v5 }
  0x17   : > { %534 = vmatpush3.msra.mxu0 %v192_v5  ;;  %576 = vmatpush3.msra.mxu1 %v192_v5 }
  0x18   : > { %535 = vmatprep.subr.mxu0 %v191_v6  ;;  %569 = vmatprep.subr.mxu1 %v191_v6 }
  0x19   : > { %536 = vmatpush3.msra.mxu0 %v191_v6  ;;  %577 = vmatpush3.msra.mxu1 %v191_v6 }
  0x1a   : > { %537 = vmatprep.subr.mxu0 %v190_v7  ;;  %570 = vmatprep.subr.mxu1 %v190_v7 }
  0x1b   : > { %538 = vmatpush3.msra.mxu0 %v190_v7  ;;  %578 = vmatpush3.msra.mxu1 %v190_v7 }
  0x1c   : > { %539 = vmatprep.mubr.msk.f32.mxu0 %vm205_vm0, %v174_v8  ;;  %551 = vmatprep.mubr.msk.f32.mxu1 %vm205_vm0, %v182_v9 }
  0x1d   : > { %540 = vmatmul.mubr.msk.f32.vlgmr.msra.gmra.mxu0 %vm205_vm0, %v175_v10  ;;  %552 = vmatmul.mubr.msk.f32.vlgmr.msra.gmra.mxu1 %vm205_vm0, %v183_v11 }
  0x1e   : > { %542 = vmatprep.mubr.msk.f32.mxu0 %vm205_vm0, %v176_v12  ;;  %554 = vmatprep.mubr.msk.f32.mxu1 %vm205_vm0, %v184_v13 }
  0x21   : > { %543 = vmatmul.mubr.msk.f32.gmra.mxu0 %vm205_vm0, %v177_v14  ;;  %555 = vmatmul.mubr.msk.f32.gmra.mxu1 %vm205_vm0, %v185_v15 }
  0x22   : > { %545 = vmatprep.mubr.msk.f32.mxu0 %vm205_vm0, %v178_v16  ;;  %557 = vmatprep.mubr.msk.f32.mxu1 %vm205_vm0, %v186_v17 }
  0x25   : > { %546 = vmatmul.mubr.msk.f32.gmra.mxu0 %vm205_vm0, %v179_v18  ;;  %558 = vmatmul.mubr.msk.f32.gmra.mxu1 %vm205_vm0, %v187_v19 }
  0x26   : > { %548 = vmatprep.mubr.msk.f32.mxu0 %vm205_vm0, %v180_v20  ;;  %560 = vmatprep.mubr.msk.f32.mxu1 %vm205_vm0, %v188_v21 }
  0x29   : > { %549 = vmatmul.mubr.msk.f32.gmra.mxu0 %vm205_vm0, %v181_v22  ;;  %561 = vmatmul.mubr.msk.f32.gmra.mxu1 %vm205_vm0, %v189_v23 }
  0xdd   : > { %v541_v25 = vpop.f32.mrf.mxu0  ;;  %v553_v26 = vpop.f32.mrf.mxu1 }
  0xde   : > { %v326_v27 = vadd.f32 %v541_v25, %v480_v24  ;;  %v366_v28 = vadd.f32 %v553_v26, %v480_v24 }
  0xdf   : > { %v320_v29 = vpop.f32.mrf.mxu0  ;;  %v360_v30 = vpop.f32.mrf.mxu1 }
  0xe0   : > { %400 = vst [vmem:[%s697_s13 + $0x8] sm:$0xff] %v326_v27  ;;  %408 = vst [vmem:[%s697_s13 + $0x48] sm:$0xff] %v366_v28  ;;  %v321_v31 = vadd.f32 %v480_v24, %v320_v29  ;;  %v361_v32 = vadd.f32 %v480_v24, %v360_v30 }
  0xe1   : > { %v544_v33 = vpop.f32.mrf.mxu0  ;;  %v556_v34 = vpop.f32.mrf.mxu1 }
  0xe2   : > { %399 = vst [vmem:[%s697_s13] sm:$0xff] %v321_v31  ;;  %407 = vst [vmem:[%s697_s13 + $0x40] sm:$0xff] %v361_v32  ;;  %v336_v35 = vadd.f32 %v544_v33, %v480_v24  ;;  %v376_v36 = vadd.f32 %v556_v34, %v480_v24 }
  0xe3   : > { %v330_v37 = vpop.f32.mrf.mxu0  ;;  %v370_v38 = vpop.f32.mrf.mxu1 }
  0xe4   : > { %402 = vst [vmem:[%s697_s13 + $0x18] sm:$0xff] %v336_v35  ;;  %410 = vst [vmem:[%s697_s13 + $0x58] sm:$0xff] %v376_v36  ;;  %v331_v39 = vadd.f32 %v480_v24, %v330_v37  ;;  %v371_v40 = vadd.f32 %v480_v24, %v370_v38 }
  0xe5   : > { %v547_v41 = vpop.f32.mrf.mxu0  ;;  %v559_v42 = vpop.f32.mrf.mxu1 }
  0xe6   : > { %401 = vst [vmem:[%s697_s13 + $0x10] sm:$0xff] %v331_v39  ;;  %409 = vst [vmem:[%s697_s13 + $0x50] sm:$0xff] %v371_v40  ;;  %v346_v43 = vadd.f32 %v547_v41, %v480_v24  ;;  %v386_v44 = vadd.f32 %v559_v42, %v480_v24 }
  0xe7   : > { %v340_v45 = vpop.f32.mrf.mxu0  ;;  %v380_v46 = vpop.f32.mrf.mxu1 }
  0xe8   : > { %404 = vst [vmem:[%s697_s13 + $0x28] sm:$0xff] %v346_v43  ;;  %412 = vst [vmem:[%s697_s13 + $0x68] sm:$0xff] %v386_v44  ;;  %v341_v47 = vadd.f32 %v480_v24, %v340_v45  ;;  %v381_v48 = vadd.f32 %v480_v24, %v380_v46 }
  0xe9   : > { %v550_v49 = vpop.f32.mrf.mxu0  ;;  %v562_v50 = vpop.f32.mrf.mxu1 }
  0xea   : > { %403 = vst [vmem:[%s697_s13 + $0x20] sm:$0xff] %v341_v47  ;;  %411 = vst [vmem:[%s697_s13 + $0x60] sm:$0xff] %v381_v48  ;;  %v356_v51 = vadd.f32 %v550_v49, %v480_v24  ;;  %v396_v52 = vadd.f32 %v562_v50, %v480_v24 }
  0xeb   : > { %v350_v53 = vpop.f32.mrf.mxu0  ;;  %v390_v54 = vpop.f32.mrf.mxu1 }
  0xec   : > { %406 = vst [vmem:[%s697_s13 + $0x38] sm:$0xff] %v356_v51  ;;  %414 = vst [vmem:[%s697_s13 + $0x78] sm:$0xff] %v396_v52  ;;  %v351_v55 = vadd.f32 %v480_v24, %v350_v53  ;;  %v391_v56 = vadd.f32 %v480_v24, %v390_v54 }
  0xee   : > { %405 = vst [vmem:[%s697_s13 + $0x30] sm:$0xff] %v351_v55  ;;  %413 = vst [vmem:[%s697_s13 + $0x70] sm:$0xff] %v391_v56 }
  0xef PF: > { %s13_s12 = sadd.s32 1, %s593_s12  }
  0xf0   : > { %p10_p4 = scmp.ge.s32.totalorder %s13_s12, 4  }
  0xf2   :  { %12 = sbr.rel (!%p10_p4) target bundleno = 1 (0x1), region = 62 }

</bundles_post_ra>
